<compile_context>
chip_gen: v7x
topology: tpu7x:2x2x1
jax: 0.10.0
libtpu: 0.0.40
codegen_flags: <defaults>
</compile_context>

<pallas_src>
import jax
import jax.numpy as jnp
from jax.experimental import pallas as pl
from jax.experimental.pallas import tpu as pltpu

# ----------------------- small BERT-ish config -----------------------
BATCH = 2
SEQ = 8
HIDDEN = 32
INTERMEDIATE = 128   # 4 * hidden, exactly one lane-tile wide


def _round_up(x, m):
    return ((x + m - 1) // m) * m


# ----------------------- Pallas kernel -----------------------
def linear_gelu_kernel(x_ref, w_ref, b_ref, o_ref):
    # x: (tm, K) bf16 | w: (K, tn) bf16 | b: (1, tn) f32 | out: (tm, tn) f32
    y = jnp.dot(x_ref[...], w_ref[...], preferred_element_type=jnp.float32)
    y = y + b_ref[...]  # (1, tn) broadcasts over rows

    # Exact-erf GELU (PyTorch F.gelu default).  lax.erf has no guaranteed Mosaic
    # lowering, so use the A&S 7.1.26 polynomial (|erf err| < 2e-7): VPU ops plus
    # a single EUP exp per element.  Kept in f32 so the same body is v5e-safe.
    # TODO(synk): on v6e/v7x a bf16 tail would double EUP/VPU throughput here.
    z = y * 0.7071067811865476            # y / sqrt(2)
    az = jnp.abs(z)
    t = 1.0 / (1.0 + 0.3275911 * az)
    poly = ((((1.061405429 * t - 1.453152027) * t + 1.421413741) * t
             - 0.284496736) * t + 0.254829592) * t
    erf_abs = 1.0 - poly * jnp.exp(-az * az)
    erf_z = jnp.where(z >= 0.0, erf_abs, -erf_abs)
    o_ref[...] = (0.5 * y * (1.0 + erf_z)).astype(o_ref.dtype)


# ----------------------- wrapper -----------------------
def ipex_intermediate_forward(hidden_states, weight, bias):
    B, S, H = hidden_states.shape
    K, N = weight.shape
    assert H == K and bias.shape == (N,)
    M = B * S

    # bf16 inputs for the MXU; accumulation stays f32 inside the kernel.
    x = hidden_states.reshape(M, K).astype(jnp.bfloat16)
    w = weight.astype(jnp.bfloat16)
    b2 = bias.reshape(1, N).astype(jnp.float32)

    # Row tile: multiple of 8 sublanes, capped at 256; pad M so tiling is exact
    # (no hard divisibility requirement on batch*seq).
    tm = min(256, _round_up(M, 8))
    m_pad = _round_up(M, tm)
    if m_pad != M:
        x = jnp.pad(x, ((0, m_pad - M), (0, 0)))

    # Lane tile: multiple of 128 (512 at real shapes -> unmasked vst, and keeps
    # the (K, tn) weight block small enough for v7x's 64 MiB VMEM).
    tn = min(N, 512)
    assert N % tn == 0 and tn % 128 == 0

    grid = (m_pad // tm, N // tn)

    cost = pl.CostEstimate(
        flops=2 * m_pad * K * N,
        transcendentals=m_pad * N,
        bytes_accessed=x.size * 2 + w.size * 2 + b2.size * 4 + m_pad * N * 4,
    )

    out = pl.pallas_call(
        linear_gelu_kernel,
        grid=grid,
        in_specs=[
            pl.BlockSpec((tm, K), lambda i, j: (i, 0)),   # activation row tile
            pl.BlockSpec((K, tn), lambda i, j: (0, j)),   # weight column tile
            pl.BlockSpec((1, tn), lambda i, j: (0, j)),   # bias column tile
        ],
        out_specs=pl.BlockSpec((tm, tn), lambda i, j: (i, j)),
        out_shape=jax.ShapeDtypeStruct((m_pad, N), jnp.float32),
        compiler_params=pltpu.CompilerParams(
            dimension_semantics=("parallel", "parallel")),
        cost_estimate=cost,
    )(x, w, b2)

    return out[:M].reshape(B, S, N)


# ----------------------- pure-JAX references -----------------------
def reference_forward(hidden_states, weight, bias, *, bf16_matmul=False):
    x = hidden_states.reshape(-1, hidden_states.shape[-1])
    if bf16_matmul:
        y = jnp.dot(x.astype(jnp.bfloat16), weight.astype(jnp.bfloat16),
                    preferred_element_type=jnp.float32)
    else:
        y = jnp.dot(x, weight)
    y = y + bias
    out = 0.5 * y * (1.0 + jax.scipy.special.erf(y * 0.7071067811865476))
    return out.reshape(*hidden_states.shape[:-1], weight.shape[-1])


# ----------------------- main -----------------------
if __name__ == "__main__":
    key = jax.random.PRNGKey(0)
    k_x, k_w, k_b = jax.random.split(key, 3)

    hidden_states = jax.random.normal(k_x, (BATCH, SEQ, HIDDEN), jnp.float32)
    # Deterministic synthetic weights; stored (in, out), i.e. pre-transposed nn.Linear.
    weight = 0.05 * jax.random.normal(k_w, (HIDDEN, INTERMEDIATE), jnp.float32)
    bias = 0.05 * jax.random.normal(k_b, (INTERMEDIATE,), jnp.float32)

    out = jax.block_until_ready(ipex_intermediate_forward(hidden_states, weight, bias))
    assert out.shape == (BATCH, SEQ, INTERMEDIATE)

    # Tight check vs a reference using the same bf16-input / f32-accumulate matmul:
    # isolates the erf-GELU numerics (polynomial |err| < 2e-7).
    ref_bf16 = reference_forward(hidden_states, weight, bias, bf16_matmul=True)
    assert jnp.allclose(out, ref_bf16, atol=1e-4, rtol=1e-4), "mismatch vs bf16-matmul reference"

    # Module-semantics check vs pure-f32 exact-erf GELU (only bf16 cast error remains).
    ref_f32 = reference_forward(hidden_states, weight, bias, bf16_matmul=False)
    assert jnp.allclose(out, ref_f32, atol=5e-3, rtol=5e-3), "mismatch vs f32 reference"

    print("KERNEL_OK")
</pallas_src>

<mosaic_0001>
module attributes {stable_mosaic.version = 11 : i64} {
  func.func @linear_gelu_kernel(%arg0: i32, %arg1: i32, %arg2: memref<16x32xbf16, #tpu.memory_space<vmem>>, %arg3: memref<32x128xbf16, #tpu.memory_space<vmem>>, %arg4: memref<1x128xf32, #tpu.memory_space<vmem>>, %arg5: memref<16x128xf32, #tpu.memory_space<vmem>>) attributes {dimension_semantics = [#tpu.dimension_semantics<parallel>, #tpu.dimension_semantics<parallel>], iteration_bounds = array<i64: 1, 1>, scalar_prefetch = 0 : i64, scratch_operands = 0 : i64, tpu.core_type = #tpu.core_type<tc>, window_params = [{transform_indices = @transform_0, window_bounds = array<i64: 16, 32>}, {transform_indices = @transform_1, window_bounds = array<i64: 32, 128>}, {transform_indices = @transform_2, window_bounds = array<i64: 1, 128>}, {transform_indices = @transform_3, window_bounds = array<i64: 16, 128>}]} {
    %c0 = arith.constant 0 : index
    %c0_0 = arith.constant 0 : index
    %0 = vector.load %arg2[%c0, %c0_0] : memref<16x32xbf16, #tpu.memory_space<vmem>>, vector<16x32xbf16>
    %c0_1 = arith.constant 0 : index
    %c0_2 = arith.constant 0 : index
    %1 = vector.load %arg3[%c0_1, %c0_2] : memref<32x128xbf16, #tpu.memory_space<vmem>>, vector<32x128xbf16>
    %cst = arith.constant dense<0.000000e+00> : vector<16x128xf32>
    %2 = tpu.matmul %0, %1, %cst {dimension_numbers = #tpu.dot_dimension_numbers<[1], [0], [0], [1], [0, 0, 1, 1], [], []>} : vector<16x32xbf16>, vector<32x128xbf16>, vector<16x128xf32> -> vector<16x128xf32>
    %c0_3 = arith.constant 0 : index
    %c0_4 = arith.constant 0 : index
    %3 = vector.load %arg4[%c0_3, %c0_4] : memref<1x128xf32, #tpu.memory_space<vmem>>, vector<1x128xf32>
    %4 = vector.broadcast %3 : vector<1x128xf32> to vector<16x128xf32>
    %5 = arith.addf %2, %4 : vector<16x128xf32>
    %cst_5 = arith.constant 0.707106769 : f32
    %6 = vector.broadcast %cst_5 : f32 to vector<16x128xf32>
    %7 = arith.mulf %5, %6 : vector<16x128xf32>
    %8 = math.absf %7 : vector<16x128xf32>
    %cst_6 = arith.constant 0.327591091 : f32
    %9 = vector.broadcast %cst_6 : f32 to vector<16x128xf32>
    %10 = arith.mulf %9, %8 : vector<16x128xf32>
    %cst_7 = arith.constant 1.000000e+00 : f32
    %11 = vector.broadcast %cst_7 : f32 to vector<16x128xf32>
    %12 = arith.addf %11, %10 : vector<16x128xf32>
    %cst_8 = arith.constant 1.000000e+00 : f32
    %13 = vector.broadcast %cst_8 : f32 to vector<16x128xf32>
    %14 = arith.divf %13, %12 : vector<16x128xf32>
    %cst_9 = arith.constant 1.06140542 : f32
    %15 = vector.broadcast %cst_9 : f32 to vector<16x128xf32>
    %16 = arith.mulf %15, %14 : vector<16x128xf32>
    %cst_10 = arith.constant 1.45315206 : f32
    %17 = vector.broadcast %cst_10 : f32 to vector<16x128xf32>
    %18 = arith.subf %16, %17 : vector<16x128xf32>
    %19 = arith.mulf %18, %14 : vector<16x128xf32>
    %cst_11 = arith.constant 1.42141378 : f32
    %20 = vector.broadcast %cst_11 : f32 to vector<16x128xf32>
    %21 = arith.addf %19, %20 : vector<16x128xf32>
    %22 = arith.mulf %21, %14 : vector<16x128xf32>
    %cst_12 = arith.constant 0.284496725 : f32
    %23 = vector.broadcast %cst_12 : f32 to vector<16x128xf32>
    %24 = arith.subf %22, %23 : vector<16x128xf32>
    %25 = arith.mulf %24, %14 : vector<16x128xf32>
    %cst_13 = arith.constant 0.254829586 : f32
    %26 = vector.broadcast %cst_13 : f32 to vector<16x128xf32>
    %27 = arith.addf %25, %26 : vector<16x128xf32>
    %28 = arith.mulf %27, %14 : vector<16x128xf32>
    %cst_14 = arith.constant 0.000000e+00 : f32
    %29 = vector.broadcast %cst_14 : f32 to vector<16x128xf32>
    %30 = arith.subf %29, %8 : vector<16x128xf32>
    %31 = arith.mulf %30, %8 : vector<16x128xf32>
    %32 = math.exp %31 : vector<16x128xf32>
    %33 = arith.mulf %28, %32 : vector<16x128xf32>
    %cst_15 = arith.constant 1.000000e+00 : f32
    %34 = vector.broadcast %cst_15 : f32 to vector<16x128xf32>
    %35 = arith.subf %34, %33 : vector<16x128xf32>
    %cst_16 = arith.constant 0.000000e+00 : f32
    %36 = vector.broadcast %cst_16 : f32 to vector<16x128xf32>
    %37 = arith.cmpf oge, %7, %36 : vector<16x128xf32>
    %cst_17 = arith.constant 0.000000e+00 : f32
    %38 = vector.broadcast %cst_17 : f32 to vector<16x128xf32>
    %39 = arith.subf %38, %35 : vector<16x128xf32>
    %40 = arith.select %37, %35, %39 : vector<16x128xi1>, vector<16x128xf32>
    %cst_18 = arith.constant 5.000000e-01 : f32
    %41 = vector.broadcast %cst_18 : f32 to vector<16x128xf32>
    %42 = arith.mulf %41, %5 : vector<16x128xf32>
    %cst_19 = arith.constant 1.000000e+00 : f32
    %43 = vector.broadcast %cst_19 : f32 to vector<16x128xf32>
    %44 = arith.addf %43, %40 : vector<16x128xf32>
    %45 = arith.mulf %42, %44 : vector<16x128xf32>
    %c0_20 = arith.constant 0 : index
    %c0_21 = arith.constant 0 : index
    %46 = vector.load %arg5[%c0_20, %c0_21] : memref<16x128xf32, #tpu.memory_space<vmem>>, vector<16x128xf32>
    tpu.vector_store %arg5[%c0_20, %c0_21], %45 {strides = array<i32>} : memref<16x128xf32, #tpu.memory_space<vmem>>, vector<16x128xf32>,
    return
  }
  func.func @transform_0(%arg0: i32, %arg1: i32) -> (i32, i32) {
    %c0_i32 = arith.constant 0 : i32
    %c0_i32_0 = arith.constant 0 : i32
    return %arg0, %c0_i32 : i32, i32
  }
  func.func @transform_1(%arg0: i32, %arg1: i32) -> (i32, i32) {
    %c0_i32 = arith.constant 0 : i32
    %c0_i32_0 = arith.constant 0 : i32
    return %c0_i32, %arg1 : i32, i32
  }
  func.func @transform_2(%arg0: i32, %arg1: i32) -> (i32, i32) {
    %c0_i32 = arith.constant 0 : i32
    %c0_i32_0 = arith.constant 0 : i32
    return %c0_i32, %arg1 : i32, i32
  }
  func.func @transform_3(%arg0: i32, %arg1: i32) -> (i32, i32) {
    %c0_i32 = arith.constant 0 : i32
    return %arg0, %arg1 : i32, i32
  }
}

</mosaic_0001>

<bundles_post_ra>
// kernel: tpu_custom_call.1
= control target key start
LH: loop header
LB: loop body
LE: loop exit
PB: predicated region body
PF: predicated region fallthrough
CT: control target
= control target key end

     0   :  { %8 = vsyncpa [#allocation3], 0  ;;  %s373_s0 = inlined_call_operand.hbm [shape: bf16[16,32], index: 0, kind: input, shape index: {}]   ;;  %s374_s1 = inlined_call_operand.hbm [shape: bf16[32,128], index: 1, kind: input, shape index: {}]   ;;  %s375_s2 = inlined_call_operand.vmem [shape: f32[1,128], index: 2, kind: input, shape index: {}]   ;;  %s376_s3 = inlined_call_operand.hbm [shape: f32[16,128], index: 3, kind: output, shape index: {}]  }
   0x1   :  { %9 = vsyncpa [#allocation6], 0 }
   0x2   :  { %10 = vsyncpa [#allocation4], 0  ;;  %s305_s12 = smov [#allocation2]   ;;  %s233_s16 = scalar_lea.hbm %s373_s0, 128 }
   0x3   :  { %s16_s13 = sshll.u32 %s305_s12, 4  ;;  %p234_p0 = scmp.ne.s32.totalorder %s373_s0, %s233_s16  ;;  %s17_s13 = int_to_ptr.vmem [resolvable:$true] %s16_s13 }
   0x4   :  { %p237_p1 = scmp.lt.u32.totalorder %s233_s16, %s373_s0 }
   0x6   :  { %p239_p2 = pnand %p237_p1, %p234_p0 }
   0x8   :  { %242 = shalt.err (!%p239_p2)
}
   0x9   :  { %s243_s21 = scalar_lea.vmem %s17_s13, 128  ;;  %p248_p4 = scmp.lt.s32.totalorder %s17_s13, %s17_s13 }
   0xa   :  { %p244_p3 = scmp.ne.s32.totalorder %s17_s13, %s243_s21  ;;  %p249_p5 = scmp.lt.s32.totalorder %s243_s21, %s243_s21 }
   0xc   :  { %p250_p6 = por %p249_p5, %p248_p4 }
   0xe   :  { %p251_p7 = pnand %p250_p6, %p244_p3 }
  0x10   :  { %254 = shalt.err (!%p251_p7)
}
  0x11   :  { %s306_s22 = smov 64   ;;  %s307_s23 = smov 4  }
  0x12   :  { %22 = dma.hbm_to_vmem [thread:$0]  %s373_s0, 128, %s17_s13, [#allocation3], %s306_s22, %s306_s22, %s307_s23  }
  0x13   :  { %s308_s26 = smov [#allocation5]   ;;  %s255_s30 = scalar_lea.hbm %s374_s1, 256 }
  0x14   :  { %s28_s27 = sshll.u32 %s308_s26, 4  ;;  %p256_p8 = scmp.ne.s32.totalorder %s374_s1, %s255_s30  ;;  %s29_s27 = int_to_ptr.vmem [resolvable:$true] %s28_s27 }
  0x15   :  { %p259_p9 = scmp.lt.u32.totalorder %s255_s30, %s374_s1 }
  0x17   :  { %p261_p10 = pnand %p259_p9, %p256_p8 }
  0x19   :  { %264 = shalt.err (!%p261_p10)
}
  0x1a   :  { %s265_s8 = scalar_lea.vmem %s29_s27, 256  ;;  %p270_p12 = scmp.lt.s32.totalorder %s29_s27, %s29_s27 }
  0x1b   :  { %p266_p11 = scmp.ne.s32.totalorder %s29_s27, %s265_s8  ;;  %p271_p13 = scmp.lt.s32.totalorder %s265_s8, %s265_s8 }
  0x1d   :  { %p272_p0 = por %p271_p13, %p270_p12 }
  0x1f   :  { %p273_p1 = pnand %p272_p0, %p266_p11 }
  0x21   :  { %276 = shalt.err (!%p273_p1)
}
  0x22   :  { %34 = dma.hbm_to_vmem [thread:$0]  %s374_s1, 256, %s29_s27, [#allocation6], %s306_s22, %s306_s22, %s307_s23  }
  0x23   :  { %299 = dma.done.wait [#allocation3], 128  }
  0x24   :  { %300 = vsyncadd [#allocation3], 4294967168 }
  0x25   :  { %301 = dma.done.wait [#allocation6], 256  }
  0x26   :  { %302 = vsyncadd [#allocation6], 4294967040  ;;  %v309_v0 = vmov 0.0   ;;  %vm310_vm0 = vmmov 0   ;;  %v222_v1 = vld [vmem:[#allocation5] sm:$0xff]   ;;  %v223_v2 = vld [vmem:[#allocation5 + $0x8] sm:$0xff]  }
  0x27   :  { %205 = vmatprep.subr.bf16.mxu0 %v309_v0  ;;  %209 = vmatprep.mubr.msk.bf16.mxu0 %vm310_vm0, %v309_v0  ;;  %v224_v3 = vld [vmem:[#allocation2] sm:$0xff]   ;;  %vm74_vm1 = vcmask 261120   ;;  %s311_s1 = smov [#allocation7]  }
  0x28   :  { %206 = vmatpush3.bf16.msra.mxu0 %v222_v1  ;;  %v193_v4 = vld [vmem:[%s375_s2] ss:$0 sm:$0xff]  ;;  %s180_s2 = sshll.u32 %s311_s1, 4  ;;  %s181_s2 = int_to_ptr.vmem [resolvable:$true] %s180_s2 }
  0x29   :  { %207 = vmatprep.subr.bf16.mxu0 %v309_v0  ;;  %s277_s12 = scalar_lea.vmem %s181_s2, 256  ;;  %p282_p3 = scmp.lt.s32.totalorder %s181_s2, %s181_s2 }
  0x2a   :  { %p278_p2 = scmp.ne.s32.totalorder %s181_s2, %s277_s12  ;;  %p283_p4 = scmp.lt.s32.totalorder %s277_s12, %s277_s12 }
  0x2c   :  { %208 = vmatpush3.bf16.msra.mxu0 %v223_v2  ;;  %p284_p5 = por %p283_p4, %p282_p3 }
  0x2e   :  { %p285_p6 = pnand %p284_p5, %p278_p2 }
  0x2f   :  { %210 = vmatmul.mubr.msk.bf16.vlgmr.msra.gmra.mrb[0].mxu0 %vm74_vm1, %v224_v3 }
 0x102   :  { %v112_v5 = vpop.f32.mrb[0].mxu0 }
 0x103   :  { %v113_v6 = vadd.f32 %v193_v4, %v112_v5  ;;  %v211_v7 = vpop.f32.mrb[1].mxu0 }
 0x104   :  { %v115_v8 = vpop.f32.mrb[2].mxu0 }
 0x105   :  { %v119_v9 = vmul.f32 0.70710677, %v113_v6  ;;  %v116_v10 = vadd.f32 %v193_v4, %v115_v8  ;;  %v212_v11 = vpop.f32.mrb[3].mxu0  ;;  %v167_v53 = vmul.f32 0.5, %v113_v6 }
 0x107   :  { %v121_v12 = vand.u32 2147483647, %v119_v9  ;;  %v120_v13 = vmul.f32 0.70710677, %v116_v10  ;;  %vm161_vm2 = vcmp.ge.f32.partialorder %v119_v9, 0.0  ;;  %v168_v58 = vmul.f32 0.5, %v116_v10 }
 0x109   :  { %v123_v14 = vmul.f32 0.3275911, %v121_v12  ;;  %v122_v15 = vand.u32 2147483647, %v120_v13  ;;  %v149_v19 = vsub.f32 0.0, %v121_v12  ;;  %vm162_vm3 = vcmp.ge.f32.partialorder %v120_v13, 0.0 }
 0x10b   :  { %v125_v16 = vadd.f32 1.0, %v123_v14  ;;  %v124_v17 = vmul.f32 0.3275911, %v122_v15  ;;  %v150_v20 = vsub.f32 0.0, %v122_v15  ;;  %v151_v22 = vmul.f32 %v149_v19, %v121_v12 }
 0x10d   :  { %225 = vrcp.f32 %v125_v16  ;;  %v126_v18 = vadd.f32 1.0, %v124_v17  ;;  %v152_v26 = vmul.f32 %v150_v20, %v122_v15  ;;  %v153_v27 = vmul.f32 1.442695, %v151_v22 }
 0x10f   :  { %227 = vrcp.f32 %v126_v18  ;;  %v155_v32 = vmul.f32 1.442695, %v152_v26 }
 0x110   :  { %229 = vpow2.f32 %v153_v27 }
 0x111   :  { %231 = vpow2.f32 %v155_v32 }
 0x117   :  { %v226_v21 = vpop.eup %225 }
 0x118   :  { %v131_v23 = vmul.f32 1.0614054, %v226_v21 }
 0x119   :  { %v228_v24 = vpop.eup %227 }
 0x11a   :  { %v198_v25 = vadd.f32 -1.4531521, %v131_v23  ;;  %v132_v28 = vmul.f32 1.0614054, %v228_v24  ;;  %v230_v43 = vpop.eup %229 }
 0x11b   :  { %v232_v47 = vpop.eup %231 }
 0x11c   :  { %v135_v29 = vmul.f32 %v226_v21, %v198_v25  ;;  %v199_v30 = vadd.f32 -1.4531521, %v132_v28 }
 0x11e   :  { %v137_v31 = vadd.f32 1.4214138, %v135_v29  ;;  %v136_v33 = vmul.f32 %v228_v24, %v199_v30 }
 0x120   :  { %v139_v34 = vmul.f32 %v226_v21, %v137_v31  ;;  %v138_v35 = vadd.f32 1.4214138, %v136_v33 }
 0x122   :  { %v200_v36 = vadd.f32 -0.28449672, %v139_v34  ;;  %v140_v37 = vmul.f32 %v228_v24, %v138_v35 }
 0x124   :  { %v143_v38 = vmul.f32 %v226_v21, %v200_v36  ;;  %v201_v39 = vadd.f32 -0.28449672, %v140_v37 }
 0x126   :  { %v145_v40 = vadd.f32 0.2548296, %v143_v38  ;;  %v144_v41 = vmul.f32 %v228_v24, %v201_v39 }
 0x128   :  { %v147_v42 = vmul.f32 %v226_v21, %v145_v40  ;;  %v146_v44 = vadd.f32 0.2548296, %v144_v41 }
 0x12a   :  { %v157_v45 = vmul.f32 %v230_v43, %v147_v42  ;;  %v148_v46 = vmul.f32 %v228_v24, %v146_v44 }
 0x12c   :  { %v159_v48 = vsub.f32 1.0, %v157_v45  ;;  %v158_v49 = vmul.f32 %v232_v47, %v148_v46 }
 0x12e   :  { %v163_v50 = vsub.f32 0.0, %v159_v48  ;;  %v160_v51 = vsub.f32 1.0, %v158_v49 }
 0x130   :  { %v165_v52 = vsel %vm161_vm2, %v159_v48, %v163_v50  ;;  %v164_v55 = vsub.f32 0.0, %v160_v51 }
 0x131   :  { %v169_v54 = vadd.f32 1.0, %v165_v52 }
 0x132   :  { %v166_v57 = vsel %vm162_vm3, %v160_v51, %v164_v55 }
 0x133   :  { %v171_v56 = vmul.f32 %v169_v54, %v167_v53  ;;  %v170_v59 = vadd.f32 1.0, %v166_v57 }
 0x135   :  { %173 = vst [vmem:[#allocation7] sm:$0xff] %v171_v56  ;;  %v172_v60 = vmul.f32 %v170_v59, %v168_v58 }
 0x137   :  { %174 = vst [vmem:[#allocation7 + $0x8] sm:$0xff] %v172_v60 }
 0x138   :  { %288 = shalt.err (!%p285_p6)
}
 0x139   :  { %s289_s15 = scalar_lea.hbm %s376_s3, 256 }
 0x13a   :  { %p290_p7 = scmp.ne.s32.totalorder %s376_s3, %s289_s15  ;;  %p293_p8 = scmp.lt.u32.totalorder %s289_s15, %s376_s3 }
 0x13c   :  { %p295_p9 = pnand %p293_p8, %p290_p7 }
 0x13e   :  { %298 = shalt.err (!%p295_p9)
}
 0x13f   :  { %s312_s20 = smov 128   ;;  %s313_s21 = smov 8  }
 0x140   :  { %186 = dma.vmem_to_hbm [thread:$0]  %s181_s2, 256, %s376_s3, [#allocation4], %s312_s20, %s312_s20, %s313_s21  }
 0x141   :  { %303 = dma.done.wait [#allocation4], 256  }
 0x142   :  { %304 = vsyncadd [#allocation4], 4294967040 }
 0x143   :  { %190 = vsyncpa [#allocation3], 1 }
 0x144   :  { %191 = vsyncpa [#allocation6], 1 }
 0x145   :  { %192 = vsyncpa [#allocation4], 1 }

</bundles_post_ra>
